<compile_context>
chip_gen: v7x
topology: tpu7x:2x2x1
jax: 0.10.0
libtpu: 0.0.40
codegen_flags: <defaults>
</compile_context>

<pallas_src>
import jax
import jax.numpy as jnp
from jax.experimental import pallas as pl
from jax.experimental.pallas import tpu as pltpu


def _round_up(n, m):
    return ((n + m - 1) // m) * m


def _pad2d(a, rows, cols):
    r, c = a.shape
    if r == rows and c == cols:
        return a
    return jnp.pad(a, ((0, rows - r), (0, cols - c)))


def _dqn_kernel(x_ref, w1_ref, b1_ref, w2_ref, b2_ref, w3_ref, b3_ref, o_ref):
    """Fused 3-layer MLP: bf16 MXU matmuls, f32 accumulation, f32 epilogue."""
    x = x_ref[...].astype(w1_ref.dtype)                        # VPU cast -> bf16
    h1 = jnp.dot(x, w1_ref[...], preferred_element_type=jnp.float32)
    h1 = jnp.maximum(h1 + b1_ref[...], 0.0)                    # f32 bias + ReLU
    h2 = jnp.dot(h1.astype(w2_ref.dtype), w2_ref[...],
                 preferred_element_type=jnp.float32)
    h2 = jnp.maximum(h2 + b2_ref[...], 0.0)
    out = jnp.dot(h2.astype(w3_ref.dtype), w3_ref[...],
                  preferred_element_type=jnp.float32)
    o_ref[...] = (out + b3_ref[...]).astype(o_ref.dtype)


def init_dqn_params(key, input_dim, hidden_dim, output_dim, dtype=jnp.float32):
    """nn.Linear-style init: uniform(-1/sqrt(fan_in), 1/sqrt(fan_in)).
    Weights stored transposed as (in_features, out_features) so the kernel
    computes y = x @ W + b directly."""
    ks = jax.random.split(key, 6)

    def linear(kw, kb, fan_in, fan_out):
        bound = 1.0 / jnp.sqrt(jnp.asarray(fan_in, dtype))
        w = jax.random.uniform(kw, (fan_in, fan_out), dtype, -bound, bound)
        b = jax.random.uniform(kb, (1, fan_out), dtype, -bound, bound)
        return w, b

    w1, b1 = linear(ks[0], ks[1], input_dim, hidden_dim)
    w2, b2 = linear(ks[2], ks[3], hidden_dim, hidden_dim)
    w3, b3 = linear(ks[4], ks[5], hidden_dim, output_dim)
    return {"w1": w1, "b1": b1, "w2": w2, "b2": b2, "w3": w3, "b3": b3}


def prepare_dqn_params(params, compute_dtype=jnp.bfloat16):
    """One-time preparation (hoisted off the per-forward path).

    * Hidden dim is zero-padded to a multiple of 128 lanes; zero weight columns
      + zero bias -> ReLU(0)=0 -> zero downstream contribution, so the math is
      unchanged.  Input and output feature dims are NOT padded.
    * Matmul weights are cast to `compute_dtype` (bf16 MXU path; on v7x an fp8
      dtype may be used instead).  Biases stay f32 for the f32 epilogue.
    """
    in_dim, hid = params["w1"].shape
    out_dim = params["w3"].shape[1]
    hid_p = _round_up(hid, 128)
    return {
        "w1": _pad2d(params["w1"], in_dim, hid_p).astype(compute_dtype),
        "b1": _pad2d(params["b1"], 1, hid_p).astype(jnp.float32),
        "w2": _pad2d(params["w2"], hid_p, hid_p).astype(compute_dtype),
        "b2": _pad2d(params["b2"], 1, hid_p).astype(jnp.float32),
        "w3": _pad2d(params["w3"], hid_p, out_dim).astype(compute_dtype),
        "b3": params["b3"].astype(jnp.float32),
    }


def _choose_batch_tiling(batch, max_rows_per_tile=512):
    """Sublane-aligned batch tiles.

    * >= 2 tiles whenever batch > 8 so v7x's two TensorCores both get work
      (the batch grid axis is marked "parallel").
    * Tiles capped at `max_rows_per_tile` rows (v6e roofline sweet spot) and
      derived with cdiv so padded-row waste stays small (v5e concern).
    """
    if batch <= 8:
        return _round_up(batch, 8), 1
    n_tiles = max(2, pl.cdiv(batch, max_rows_per_tile))
    tb = _round_up(pl.cdiv(batch, n_tiles), 8)
    return tb, n_tiles


def dqn_forward(x, prepared, *, max_rows_per_tile=512):
    """Fused 3-layer MLP forward.

    x: (batch, input_dim) float32
    prepared: output of prepare_dqn_params (padded, bf16 weights; f32 biases)
    """
    w1, b1 = prepared["w1"], prepared["b1"]
    w2, b2 = prepared["w2"], prepared["b2"]
    w3, b3 = prepared["w3"], prepared["b3"]

    batch, in_dim = x.shape
    assert in_dim == w1.shape[0], "input_dim mismatch"
    hid_p = w1.shape[1]
    out_dim = w3.shape[1]

    tb, n_tiles = _choose_batch_tiling(batch, max_rows_per_tile)
    batch_p = tb * n_tiles
    # Only the batch/sublane dim is ever padded; x is NOT lane-padded (a block
    # dim equal to the full array dim is legal even when < 128).
    x_p = x if batch_p == batch else jnp.pad(x, ((0, batch_p - batch), (0, 0)))

    def call(single_buffer_weights):
        if single_buffer_weights:
            # Weights/biases never change block index -> one VMEM buffer each.
            resident = lambda shape: pl.BlockSpec(
                shape, lambda i: (0, 0), pipeline_mode=pl.Buffered(1))
        else:
            resident = lambda shape: pl.BlockSpec(shape, lambda i: (0, 0))
        return pl.pallas_call(
            _dqn_kernel,
            out_shape=jax.ShapeDtypeStruct((batch_p, out_dim), x.dtype),
            grid=(n_tiles,),
            in_specs=[
                pl.BlockSpec((tb, in_dim), lambda i: (i, 0)),  # x: streamed
                resident((in_dim, hid_p)),                     # w1 (bf16)
                resident((1, hid_p)),                          # b1 (f32)
                resident((hid_p, hid_p)),                      # w2 (bf16)
                resident((1, hid_p)),                          # b2 (f32)
                resident((hid_p, out_dim)),                    # w3 (bf16)
                resident((1, out_dim)),                        # b3 (f32)
            ],
            out_specs=pl.BlockSpec((tb, out_dim), lambda i: (i, 0)),
            compiler_params=pltpu.CompilerParams(
                dimension_semantics=("parallel",),
                vmem_limit_bytes=64 * 1024 * 1024),
        )(x_p, w1, b1, w2, b2, w3, b3)

    try:
        out = call(single_buffer_weights=True)
    except Exception:
        # This jax/Mosaic build rejects pipeline_mode=pl.Buffered(1) on
        # pallas_call inputs; fall back to default double-buffered residents.
        out = call(single_buffer_weights=False)

    return out if batch_p == batch else out[:batch]


def dqn_reference(x, params, mxu_dtype=None):
    """Pure-JAX reference (same math as the PyTorch forward).  If `mxu_dtype`
    is given, matmul operands are rounded to it (mirroring the kernel's bf16
    MXU path) while accumulation stays f32."""
    if mxu_dtype is None:
        cast = lambda a: a
    else:
        cast = lambda a: a.astype(mxu_dtype).astype(jnp.float32)
    dot = lambda a, b: jnp.dot(cast(a), cast(b),
                               precision=jax.lax.Precision.HIGHEST)
    h1 = jnp.maximum(dot(x, params["w1"]) + params["b1"], 0.0)
    h2 = jnp.maximum(dot(h1, params["w2"]) + params["b2"], 0.0)
    return dot(h2, params["w3"]) + params["b3"]


if __name__ == "__main__":
    key = jax.random.PRNGKey(0)
    k_param, k_x = jax.random.split(key)

    # Small shapes consistent with the DQN module (state_dim -> hidden -> actions).
    batch, input_dim, hidden_dim, output_dim = 8, 16, 32, 4
    params = init_dqn_params(k_param, input_dim, hidden_dim, output_dim)
    prepared = prepare_dqn_params(params)            # one-time pad + bf16 cast
    x = jax.random.normal(k_x, (batch, input_dim), dtype=jnp.float32)

    out = jax.block_until_ready(dqn_forward(x, prepared))
    assert out.shape == (batch, output_dim)

    # Tight check vs a reference that rounds matmul operands to bf16 exactly
    # like the kernel does (both accumulate in f32).
    ref_bf16 = dqn_reference(x, params, mxu_dtype=jnp.bfloat16)
    assert jnp.allclose(out, ref_bf16, atol=1e-3, rtol=1e-3), "mismatch vs bf16 ref"

    # Loose sanity check vs the full-f32 reference (kernel uses bf16 MXU operands).
    ref_f32 = dqn_reference(x, params)
    assert jnp.allclose(out, ref_f32, atol=5e-2, rtol=5e-2), "mismatch vs f32 ref"

    print("KERNEL_OK")
</pallas_src>

<mosaic_0001>
module attributes {stable_mosaic.version = 11 : i64} {
  func.func @_dqn_kernel(%arg0: i32, %arg1: memref<8x16xf32, #tpu.memory_space<vmem>>, %arg2: memref<16x128xbf16, #tpu.memory_space<vmem>>, %arg3: memref<1x128xf32, #tpu.memory_space<vmem>>, %arg4: memref<128x128xbf16, #tpu.memory_space<vmem>>, %arg5: memref<1x128xf32, #tpu.memory_space<vmem>>, %arg6: memref<128x4xbf16, #tpu.memory_space<vmem>>, %arg7: memref<1x4xf32, #tpu.memory_space<vmem>>, %arg8: memref<8x4xf32, #tpu.memory_space<vmem>>) attributes {dimension_semantics = [#tpu.dimension_semantics<parallel>], iteration_bounds = array<i64: 1>, scalar_prefetch = 0 : i64, scratch_operands = 0 : i64, tpu.core_type = #tpu.core_type<tc>, window_params = [{transform_indices = @transform_0, window_bounds = array<i64: 8, 16>}, {pipeline_mode = #tpu.pipeline_mode<synchronous>, transform_indices = @transform_1, window_bounds = array<i64: 16, 128>}, {pipeline_mode = #tpu.pipeline_mode<synchronous>, transform_indices = @transform_2, window_bounds = array<i64: 1, 128>}, {pipeline_mode = #tpu.pipeline_mode<synchronous>, transform_indices = @transform_3, window_bounds = array<i64: 128, 128>}, {pipeline_mode = #tpu.pipeline_mode<synchronous>, transform_indices = @transform_4, window_bounds = array<i64: 1, 128>}, {pipeline_mode = #tpu.pipeline_mode<synchronous>, transform_indices = @transform_5, window_bounds = array<i64: 128, 4>}, {pipeline_mode = #tpu.pipeline_mode<synchronous>, transform_indices = @transform_6, window_bounds = array<i64: 1, 4>}, {transform_indices = @transform_7, window_bounds = array<i64: 8, 4>}]} {
    %c0 = arith.constant 0 : index
    %c0_0 = arith.constant 0 : index
    %0 = vector.load %arg1[%c0, %c0_0] : memref<8x16xf32, #tpu.memory_space<vmem>>, vector<8x16xf32>
    %1 = arith.truncf %0 : vector<8x16xf32> to vector<8x16xbf16>
    %c0_1 = arith.constant 0 : index
    %c0_2 = arith.constant 0 : index
    %2 = vector.load %arg2[%c0_1, %c0_2] : memref<16x128xbf16, #tpu.memory_space<vmem>>, vector<16x128xbf16>
    %cst = arith.constant dense<0.000000e+00> : vector<8x128xf32>
    %3 = tpu.matmul %1, %2, %cst {dimension_numbers = #tpu.dot_dimension_numbers<[1], [0], [0], [1], [0, 0, 1, 1], [], []>} : vector<8x16xbf16>, vector<16x128xbf16>, vector<8x128xf32> -> vector<8x128xf32>
    %c0_3 = arith.constant 0 : index
    %c0_4 = arith.constant 0 : index
    %4 = vector.load %arg3[%c0_3, %c0_4] : memref<1x128xf32, #tpu.memory_space<vmem>>, vector<1x128xf32>
    %5 = vector.broadcast %4 : vector<1x128xf32> to vector<8x128xf32>
    %6 = arith.addf %3, %5 : vector<8x128xf32>
    %cst_5 = arith.constant 0.000000e+00 : f32
    %7 = vector.broadcast %cst_5 : f32 to vector<8x128xf32>
    %8 = arith.maximumf %6, %7 : vector<8x128xf32>
    %9 = arith.truncf %8 : vector<8x128xf32> to vector<8x128xbf16>
    %c0_6 = arith.constant 0 : index
    %c0_7 = arith.constant 0 : index
    %10 = vector.load %arg4[%c0_6, %c0_7] : memref<128x128xbf16, #tpu.memory_space<vmem>>, vector<128x128xbf16>
    %cst_8 = arith.constant dense<0.000000e+00> : vector<8x128xf32>
    %11 = tpu.matmul %9, %10, %cst_8 {dimension_numbers = #tpu.dot_dimension_numbers<[1], [0], [0], [1], [0, 0, 1, 1], [], []>} : vector<8x128xbf16>, vector<128x128xbf16>, vector<8x128xf32> -> vector<8x128xf32>
    %c0_9 = arith.constant 0 : index
    %c0_10 = arith.constant 0 : index
    %12 = vector.load %arg5[%c0_9, %c0_10] : memref<1x128xf32, #tpu.memory_space<vmem>>, vector<1x128xf32>
    %13 = vector.broadcast %12 : vector<1x128xf32> to vector<8x128xf32>
    %14 = arith.addf %11, %13 : vector<8x128xf32>
    %cst_11 = arith.constant 0.000000e+00 : f32
    %15 = vector.broadcast %cst_11 : f32 to vector<8x128xf32>
    %16 = arith.maximumf %14, %15 : vector<8x128xf32>
    %17 = arith.truncf %16 : vector<8x128xf32> to vector<8x128xbf16>
    %c0_12 = arith.constant 0 : index
    %c0_13 = arith.constant 0 : index
    %18 = vector.load %arg6[%c0_12, %c0_13] : memref<128x4xbf16, #tpu.memory_space<vmem>>, vector<128x4xbf16>
    %cst_14 = arith.constant dense<0.000000e+00> : vector<8x4xf32>
    %19 = tpu.matmul %17, %18, %cst_14 {dimension_numbers = #tpu.dot_dimension_numbers<[1], [0], [0], [1], [0, 0, 1, 1], [], []>} : vector<8x128xbf16>, vector<128x4xbf16>, vector<8x4xf32> -> vector<8x4xf32>
    %c0_15 = arith.constant 0 : index
    %c0_16 = arith.constant 0 : index
    %20 = vector.load %arg7[%c0_15, %c0_16] : memref<1x4xf32, #tpu.memory_space<vmem>>, vector<1x4xf32>
    %21 = vector.broadcast %20 : vector<1x4xf32> to vector<8x4xf32>
    %22 = arith.addf %19, %21 : vector<8x4xf32>
    %c0_17 = arith.constant 0 : index
    %c0_18 = arith.constant 0 : index
    %23 = vector.load %arg8[%c0_17, %c0_18] : memref<8x4xf32, #tpu.memory_space<vmem>>, vector<8x4xf32>
    tpu.vector_store %arg8[%c0_17, %c0_18], %22 {strides = array<i32>} : memref<8x4xf32, #tpu.memory_space<vmem>>, vector<8x4xf32>,
    return
  }
  func.func @transform_0(%arg0: i32) -> (i32, i32) {
    %c0_i32 = arith.constant 0 : i32
    %c0_i32_0 = arith.constant 0 : i32
    return %arg0, %c0_i32 : i32, i32
  }
  func.func @transform_1(%arg0: i32) -> (i32, i32) {
    %c0_i32 = arith.constant 0 : i32
    %c0_i32_0 = arith.constant 0 : i32
    %c0_i32_1 = arith.constant 0 : i32
    return %c0_i32, %c0_i32_0 : i32, i32
  }
  func.func @transform_2(%arg0: i32) -> (i32, i32) {
    %c0_i32 = arith.constant 0 : i32
    %c0_i32_0 = arith.constant 0 : i32
    %c0_i32_1 = arith.constant 0 : i32
    return %c0_i32, %c0_i32_0 : i32, i32
  }
  func.func @transform_3(%arg0: i32) -> (i32, i32) {
    %c0_i32 = arith.constant 0 : i32
    %c0_i32_0 = arith.constant 0 : i32
    %c0_i32_1 = arith.constant 0 : i32
    return %c0_i32, %c0_i32_0 : i32, i32
  }
  func.func @transform_4(%arg0: i32) -> (i32, i32) {
    %c0_i32 = arith.constant 0 : i32
    %c0_i32_0 = arith.constant 0 : i32
    %c0_i32_1 = arith.constant 0 : i32
    return %c0_i32, %c0_i32_0 : i32, i32
  }
  func.func @transform_5(%arg0: i32) -> (i32, i32) {
    %c0_i32 = arith.constant 0 : i32
    %c0_i32_0 = arith.constant 0 : i32
    %c0_i32_1 = arith.constant 0 : i32
    return %c0_i32, %c0_i32_0 : i32, i32
  }
  func.func @transform_6(%arg0: i32) -> (i32, i32) {
    %c0_i32 = arith.constant 0 : i32
    %c0_i32_0 = arith.constant 0 : i32
    %c0_i32_1 = arith.constant 0 : i32
    return %c0_i32, %c0_i32_0 : i32, i32
  }
  func.func @transform_7(%arg0: i32) -> (i32, i32) {
    %c0_i32 = arith.constant 0 : i32
    %c0_i32_0 = arith.constant 0 : i32
    return %arg0, %c0_i32 : i32, i32
  }
}

module attributes {stable_mosaic.version = 11 : i64} {
  func.func @_dqn_kernel(%arg0: i32, %arg1: memref<8x16xf32, #tpu.memory_space<vmem>>, %arg2: memref<16x128xbf16, #tpu.memory_space<vmem>>, %arg3: memref<1x128xf32, #tpu.memory_space<vmem>>, %arg4: memref<128x128xbf16, #tpu.memory_space<vmem>>, %arg5: memref<1x128xf32, #tpu.memory_space<vmem>>, %arg6: memref<128x4xbf16, #tpu.memory_space<vmem>>, %arg7: memref<1x4xf32, #tpu.memory_space<vmem>>, %arg8: memref<8x4xf32, #tpu.memory_space<vmem>>) attributes {dimension_semantics = [#tpu.dimension_semantics<parallel>], iteration_bounds = array<i64: 1>, scalar_prefetch = 0 : i64, scratch_operands = 0 : i64, tpu.core_type = #tpu.core_type<tc>, window_params = [{transform_indices = @transform_0, window_bounds = array<i64: 8, 16>}, {pipeline_mode = #tpu.pipeline_mode<synchronous>, transform_indices = @transform_1, window_bounds = array<i64: 16, 128>}, {pipeline_mode = #tpu.pipeline_mode<synchronous>, transform_indices = @transform_2, window_bounds = array<i64: 1, 128>}, {pipeline_mode = #tpu.pipeline_mode<synchronous>, transform_indices = @transform_3, window_bounds = array<i64: 128, 128>}, {pipeline_mode = #tpu.pipeline_mode<synchronous>, transform_indices = @transform_4, window_bounds = array<i64: 1, 128>}, {pipeline_mode = #tpu.pipeline_mode<synchronous>, transform_indices = @transform_5, window_bounds = array<i64: 128, 4>}, {pipeline_mode = #tpu.pipeline_mode<synchronous>, transform_indices = @transform_6, window_bounds = array<i64: 1, 4>}, {transform_indices = @transform_7, window_bounds = array<i64: 8, 4>}]} {
    %c0 = arith.constant 0 : index
    %c0_0 = arith.constant 0 : index
    %0 = vector.load %arg1[%c0, %c0_0] : memref<8x16xf32, #tpu.memory_space<vmem>>, vector<8x16xf32>
    %1 = arith.truncf %0 : vector<8x16xf32> to vector<8x16xbf16>
    %c0_1 = arith.constant 0 : index
    %c0_2 = arith.constant 0 : index
    %2 = vector.load %arg2[%c0_1, %c0_2] : memref<16x128xbf16, #tpu.memory_space<vmem>>, vector<16x128xbf16>
    %cst = arith.constant dense<0.000000e+00> : vector<8x128xf32>
    %3 = tpu.matmul %1, %2, %cst {dimension_numbers = #tpu.dot_dimension_numbers<[1], [0], [0], [1], [0, 0, 1, 1], [], []>} : vector<8x16xbf16>, vector<16x128xbf16>, vector<8x128xf32> -> vector<8x128xf32>
    %c0_3 = arith.constant 0 : index
    %c0_4 = arith.constant 0 : index
    %4 = vector.load %arg3[%c0_3, %c0_4] : memref<1x128xf32, #tpu.memory_space<vmem>>, vector<1x128xf32>
    %5 = vector.broadcast %4 : vector<1x128xf32> to vector<8x128xf32>
    %6 = arith.addf %3, %5 : vector<8x128xf32>
    %cst_5 = arith.constant 0.000000e+00 : f32
    %7 = vector.broadcast %cst_5 : f32 to vector<8x128xf32>
    %8 = arith.maximumf %6, %7 : vector<8x128xf32>
    %9 = arith.truncf %8 : vector<8x128xf32> to vector<8x128xbf16>
    %c0_6 = arith.constant 0 : index
    %c0_7 = arith.constant 0 : index
    %10 = vector.load %arg4[%c0_6, %c0_7] : memref<128x128xbf16, #tpu.memory_space<vmem>>, vector<128x128xbf16>
    %cst_8 = arith.constant dense<0.000000e+00> : vector<8x128xf32>
    %11 = tpu.matmul %9, %10, %cst_8 {dimension_numbers = #tpu.dot_dimension_numbers<[1], [0], [0], [1], [0, 0, 1, 1], [], []>} : vector<8x128xbf16>, vector<128x128xbf16>, vector<8x128xf32> -> vector<8x128xf32>
    %c0_9 = arith.constant 0 : index
    %c0_10 = arith.constant 0 : index
    %12 = vector.load %arg5[%c0_9, %c0_10] : memref<1x128xf32, #tpu.memory_space<vmem>>, vector<1x128xf32>
    %13 = vector.broadcast %12 : vector<1x128xf32> to vector<8x128xf32>
    %14 = arith.addf %11, %13 : vector<8x128xf32>
    %cst_11 = arith.constant 0.000000e+00 : f32
    %15 = vector.broadcast %cst_11 : f32 to vector<8x128xf32>
    %16 = arith.maximumf %14, %15 : vector<8x128xf32>
    %17 = arith.truncf %16 : vector<8x128xf32> to vector<8x128xbf16>
    %c0_12 = arith.constant 0 : index
    %c0_13 = arith.constant 0 : index
    %18 = vector.load %arg6[%c0_12, %c0_13] : memref<128x4xbf16, #tpu.memory_space<vmem>>, vector<128x4xbf16>
    %cst_14 = arith.constant dense<0.000000e+00> : vector<8x4xf32>
    %19 = tpu.matmul %17, %18, %cst_14 {dimension_numbers = #tpu.dot_dimension_numbers<[1], [0], [0], [1], [0, 0, 1, 1], [], []>} : vector<8x128xbf16>, vector<128x4xbf16>, vector<8x4xf32> -> vector<8x4xf32>
    %c0_15 = arith.constant 0 : index
    %c0_16 = arith.constant 0 : index
    %20 = vector.load %arg7[%c0_15, %c0_16] : memref<1x4xf32, #tpu.memory_space<vmem>>, vector<1x4xf32>
    %21 = vector.broadcast %20 : vector<1x4xf32> to vector<8x4xf32>
    %22 = arith.addf %19, %21 : vector<8x4xf32>
    %c0_17 = arith.constant 0 : index
    %c0_18 = arith.constant 0 : index
    %23 = vector.load %arg8[%c0_17, %c0_18] : memref<8x4xf32, #tpu.memory_space<vmem>>, vector<8x4xf32>
    tpu.vector_store %arg8[%c0_17, %c0_18], %22 {strides = array<i32>} : memref<8x4xf32, #tpu.memory_space<vmem>>, vector<8x4xf32>,
    return
  }
  func.func @transform_0(%arg0: i32) -> (i32, i32) {
    %c0_i32 = arith.constant 0 : i32
    %c0_i32_0 = arith.constant 0 : i32
    return %arg0, %c0_i32 : i32, i32
  }
  func.func @transform_1(%arg0: i32) -> (i32, i32) {
    %c0_i32 = arith.constant 0 : i32
    %c0_i32_0 = arith.constant 0 : i32
    %c0_i32_1 = arith.constant 0 : i32
    return %c0_i32, %c0_i32_0 : i32, i32
  }
  func.func @transform_2(%arg0: i32) -> (i32, i32) {
    %c0_i32 = arith.constant 0 : i32
    %c0_i32_0 = arith.constant 0 : i32
    %c0_i32_1 = arith.constant 0 : i32
    return %c0_i32, %c0_i32_0 : i32, i32
  }
  func.func @transform_3(%arg0: i32) -> (i32, i32) {
    %c0_i32 = arith.constant 0 : i32
    %c0_i32_0 = arith.constant 0 : i32
    %c0_i32_1 = arith.constant 0 : i32
    return %c0_i32, %c0_i32_0 : i32, i32
  }
  func.func @transform_4(%arg0: i32) -> (i32, i32) {
    %c0_i32 = arith.constant 0 : i32
    %c0_i32_0 = arith.constant 0 : i32
    %c0_i32_1 = arith.constant 0 : i32
    return %c0_i32, %c0_i32_0 : i32, i32
  }
  func.func @transform_5(%arg0: i32) -> (i32, i32) {
    %c0_i32 = arith.constant 0 : i32
    %c0_i32_0 = arith.constant 0 : i32
    %c0_i32_1 = arith.constant 0 : i32
    return %c0_i32, %c0_i32_0 : i32, i32
  }
  func.func @transform_6(%arg0: i32) -> (i32, i32) {
    %c0_i32 = arith.constant 0 : i32
    %c0_i32_0 = arith.constant 0 : i32
    %c0_i32_1 = arith.constant 0 : i32
    return %c0_i32, %c0_i32_0 : i32, i32
  }
  func.func @transform_7(%arg0: i32) -> (i32, i32) {
    %c0_i32 = arith.constant 0 : i32
    %c0_i32_0 = arith.constant 0 : i32
    return %arg0, %c0_i32 : i32, i32
  }
}

</mosaic_0001>

<bundles_post_ra>
// kernel: tpu_custom_call.1
= control target key start
LH: loop header
LB: loop body
LE: loop exit
PB: predicated region body
PF: predicated region fallthrough
CT: control target
= control target key end

     0   :  { %12 = vsyncpa [#allocation3], 0  ;;  %s901_s0 = inlined_call_operand.hbm [shape: f32[8,16], index: 0, kind: input, shape index: {}]   ;;  %s902_s1 = inlined_call_operand.hbm [shape: bf16[16,128], index: 1, kind: input, shape index: {}]   ;;  %s903_s2 = inlined_call_operand.hbm [shape: f32[1,128], index: 2, kind: input, shape index: {}]   ;;  %s904_s3 = inlined_call_operand.hbm [shape: bf16[128,128], index: 3, kind: input, shape index: {}]   ;;  %s905_s4 = inlined_call_operand.hbm [shape: f32[1,128], index: 4, kind: input, shape index: {}]   ;;  %s906_s5 = inlined_call_operand.hbm [shape: bf16[128,4], index: 5, kind: input, shape index: {}]   ;;  %s907_s6 = inlined_call_operand.hbm [shape: f32[1,4], index: 6, kind: input, shape index: {}]   ;;  %s908_s7 = inlined_call_operand.hbm [shape: f32[8,4], index: 7, kind: output, shape index: {}]  }
   0x1   :  { %13 = vsyncpa [#allocation6], 0 }
   0x2   :  { %14 = vsyncpa [#allocation9], 0 }
   0x3   :  { %15 = vsyncpa [#allocation12], 0 }
   0x4   :  { %16 = vsyncpa [#allocation4], 0  ;;  %s724_s24 = smov [#allocation5]   ;;  %s538_s28 = scalar_lea.hbm %s902_s1, 128 }
   0x5   :  { %s32_s25 = sshll.u32 %s724_s24, 4  ;;  %p539_p0 = scmp.ne.s32.totalorder %s902_s1, %s538_s28  ;;  %s33_s25 = int_to_ptr.vmem [resolvable:$true] %s32_s25 }
   0x6   :  { %p542_p1 = scmp.lt.u32.totalorder %s538_s28, %s902_s1 }
   0x8   :  { %p544_p2 = pnand %p542_p1, %p539_p0 }
   0xa   :  { %547 = shalt.err (!%p544_p2)
}
   0xb   :  { %s548_s10 = scalar_lea.vmem %s33_s25, 128  ;;  %p553_p4 = scmp.lt.s32.totalorder %s33_s25, %s33_s25 }
   0xc   :  { %p549_p3 = scmp.ne.s32.totalorder %s33_s25, %s548_s10  ;;  %p554_p5 = scmp.lt.s32.totalorder %s548_s10, %s548_s10 }
   0xe   :  { %p555_p6 = por %p554_p5, %p553_p4 }
  0x10   :  { %p556_p7 = pnand %p555_p6, %p549_p3 }
  0x12   :  { %559 = shalt.err (!%p556_p7)
}
  0x13   :  { %s725_s11 = smov 64   ;;  %s726_s12 = smov 4  }
  0x14   :  { %38 = dma.hbm_to_vmem [thread:$0]  %s902_s1, 128, %s33_s25, [#allocation6], %s725_s11, %s725_s11, %s726_s12  }
  0x15   :  { %s727_s15 = smov [#allocation8]   ;;  %s728_s17 = smov [#allocation11]  }
  0x16   :  { %s54_s16 = sshll.u32 %s727_s15, 4  ;;  %s76_s18 = sshll.u32 %s728_s17, 4  ;;  %s55_s16 = int_to_ptr.vmem [resolvable:$true] %s54_s16  ;;  %s77_s18 = int_to_ptr.vmem [resolvable:$true] %s76_s18 }
  0x17   :  { %s560_s21 = scalar_lea.hbm %s904_s3, 1024 }
  0x18   :  { %p561_p8 = scmp.ne.s32.totalorder %s904_s3, %s560_s21  ;;  %p564_p9 = scmp.lt.u32.totalorder %s560_s21, %s904_s3 }
  0x1a   :  { %p566_p10 = pnand %p564_p9, %p561_p8 }
  0x1c   :  { %569 = shalt.err (!%p566_p10)
}
  0x1d   :  { %s570_s1 = scalar_lea.vmem %s55_s16, 1024  ;;  %p575_p12 = scmp.lt.s32.totalorder %s55_s16, %s55_s16 }
  0x1e   :  { %p571_p11 = scmp.ne.s32.totalorder %s55_s16, %s570_s1  ;;  %p576_p13 = scmp.lt.s32.totalorder %s570_s1, %s570_s1 }
  0x20   :  { %p577_p0 = por %p576_p13, %p575_p12 }
  0x22   :  { %p578_p1 = pnand %p577_p0, %p571_p11 }
  0x24   :  { %581 = shalt.err (!%p578_p1)
}
  0x25   :  { %60 = dma.hbm_to_vmem [thread:$0]  %s904_s3, 1024, %s55_s16, [#allocation9], %s725_s11, %s725_s11, %s726_s12  }
  0x26   :  { %s582_s30 = scalar_lea.hbm %s906_s5, 1024 }
  0x27   :  { %p583_p2 = scmp.ne.s32.totalorder %s906_s5, %s582_s30  ;;  %p586_p3 = scmp.lt.u32.totalorder %s582_s30, %s906_s5 }
  0x29   :  { %p588_p4 = pnand %p586_p3, %p583_p2 }
  0x2b   :  { %591 = shalt.err (!%p588_p4)
}
  0x2c   :  { %s592_s14 = scalar_lea.vmem %s77_s18, 1024  ;;  %p597_p6 = scmp.lt.s32.totalorder %s77_s18, %s77_s18 }
  0x2d   :  { %p593_p5 = scmp.ne.s32.totalorder %s77_s18, %s592_s14  ;;  %p598_p7 = scmp.lt.s32.totalorder %s592_s14, %s592_s14 }
  0x2f   :  { %p599_p8 = por %p598_p7, %p597_p6 }
  0x31   :  { %p600_p9 = pnand %p599_p8, %p593_p5 }
  0x33   :  { %603 = shalt.err (!%p600_p9)
}
  0x34   :  { %82 = dma.hbm_to_vmem [thread:$0]  %s906_s5, 1024, %s77_s18, [#allocation12], %s725_s11, %s725_s11, %s726_s12  }
  0x35   :  { %s729_s16 = smov [#allocation2]   ;;  %s730_s19 = smov [#allocation7]  }
  0x36   :  { %s23_s17 = sshll.u32 %s729_s16, 4  ;;  %s45_s20 = sshll.u32 %s730_s19, 4  ;;  %s24_s17 = int_to_ptr.vmem [resolvable:$true] %s23_s17  ;;  %s46_s20 = int_to_ptr.vmem [resolvable:$true] %s45_s20 }
  0x37   :  { %s604_s23 = scalar_lea.hbm %s901_s0, 128 }
  0x38   :  { %p605_p10 = scmp.ne.s32.totalorder %s901_s0, %s604_s23  ;;  %p608_p11 = scmp.lt.u32.totalorder %s604_s23, %s901_s0 }
  0x3a   :  { %p610_p12 = pnand %p608_p11, %p605_p10 }
  0x3c   :  { %613 = shalt.err (!%p610_p12)
}
  0x3d   :  { %s614_s5 = scalar_lea.vmem %s24_s17, 128  ;;  %p619_p0 = scmp.lt.s32.totalorder %s24_s17, %s24_s17 }
  0x3e   :  { %p615_p13 = scmp.ne.s32.totalorder %s24_s17, %s614_s5  ;;  %p620_p1 = scmp.lt.s32.totalorder %s614_s5, %s614_s5 }
  0x40   :  { %p621_p2 = por %p620_p1, %p619_p0 }
  0x42   :  { %p622_p3 = pnand %p621_p2, %p615_p13 }
  0x44   :  { %625 = shalt.err (!%p622_p3)
}
  0x45   :  { %26 = dma.hbm_to_vmem [thread:$0]  %s901_s0, 128, %s24_s17, [#allocation3]  }
  0x46   :  { %s626_s28 = scalar_lea.hbm %s903_s2, 16 }
  0x47   :  { %p627_p4 = scmp.ne.s32.totalorder %s903_s2, %s626_s28  ;;  %p630_p5 = scmp.lt.u32.totalorder %s626_s28, %s903_s2 }
  0x49   :  { %p632_p6 = pnand %p630_p5, %p627_p4 }
  0x4b   :  { %635 = shalt.err (!%p632_p6)
}
  0x4c   :  { %s636_s10 = scalar_lea.vmem %s46_s20, 16  ;;  %s640_s13 = scalar_lea.vmem %s46_s20, 32 }
  0x4d   :  { %p637_p7 = scmp.ne.s32.totalorder %s46_s20, %s636_s10  ;;  %p641_p8 = scmp.lt.s32.totalorder %s46_s20, %s46_s20 }
  0x4e   :  { %p642_p9 = scmp.lt.s32.totalorder %s640_s13, %s636_s10 }
  0x50   :  { %p643_p10 = por %p642_p9, %p641_p8 }
  0x52   :  { %p644_p11 = pnand %p643_p10, %p637_p7 }
  0x54   :  { %647 = shalt.err (!%p644_p11)
}
  0x55   :  { %48 = dma.hbm_to_vmem [thread:$0]  %s903_s2, 16, %s46_s20, [#allocation6]  }
  0x56   :  { %s731_s3 = smov [#allocation10]   ;;  %s732_s16 = smov [#allocation13]  }
  0x57   :  { %s67_s15 = sshll.u32 %s731_s3, 4  ;;  %s89_s17 = sshll.u32 %s732_s16, 4  ;;  %s68_s15 = int_to_ptr.vmem [resolvable:$true] %s67_s15  ;;  %s90_s17 = int_to_ptr.vmem [resolvable:$true] %s89_s17 }
  0x58   :  { %s648_s22 = scalar_lea.hbm %s905_s4, 16 }
  0x59   :  { %p649_p12 = scmp.ne.s32.totalorder %s905_s4, %s648_s22  ;;  %p652_p13 = scmp.lt.u32.totalorder %s648_s22, %s905_s4 }
  0x5b   :  { %p654_p0 = pnand %p652_p13, %p649_p12 }
  0x5d   :  { %657 = shalt.err (!%p654_p0)
}
  0x5e   :  { %s658_s2 = scalar_lea.vmem %s68_s15, 16  ;;  %s662_s20 = scalar_lea.vmem %s68_s15, 32 }
  0x5f   :  { %p659_p1 = scmp.ne.s32.totalorder %s68_s15, %s658_s2  ;;  %p663_p2 = scmp.lt.s32.totalorder %s68_s15, %s68_s15 }
  0x60   :  { %p664_p3 = scmp.lt.s32.totalorder %s662_s20, %s658_s2 }
  0x62   :  { %p665_p4 = por %p664_p3, %p663_p2 }
  0x64   :  { %p666_p5 = pnand %p665_p4, %p659_p1 }
  0x66   :  { %669 = shalt.err (!%p666_p5)
}
  0x67   :  { %70 = dma.hbm_to_vmem [thread:$0]  %s905_s4, 16, %s68_s15, [#allocation9]  }
  0x68   :  { %s670_s18 = scalar_lea.hbm %s907_s6, 16 }
  0x69   :  { %p671_p6 = scmp.ne.s32.totalorder %s907_s6, %s670_s18  ;;  %p674_p7 = scmp.lt.u32.totalorder %s670_s18, %s907_s6 }
  0x6b   :  { %p676_p8 = pnand %p674_p7, %p671_p6 }
  0x6d   :  { %679 = shalt.err (!%p676_p8)
}
  0x6e   :  { %s680_s8 = scalar_lea.vmem %s90_s17, 16  ;;  %s684_s9 = scalar_lea.vmem %s90_s17, 32 }
  0x6f   :  { %p681_p9 = scmp.ne.s32.totalorder %s90_s17, %s680_s8  ;;  %p685_p10 = scmp.lt.s32.totalorder %s90_s17, %s90_s17 }
  0x70   :  { %p686_p11 = scmp.lt.s32.totalorder %s684_s9, %s680_s8 }
  0x72   :  { %p687_p12 = por %p686_p11, %p685_p10 }
  0x74   :  { %p688_p13 = pnand %p687_p12, %p681_p9 }
  0x76   :  { %691 = shalt.err (!%p688_p13)
}
  0x77   :  { %92 = dma.hbm_to_vmem [thread:$0]  %s907_s6, 16, %s90_s17, [#allocation12]  }
  0x78   :  { %714 = dma.done.wait [#allocation3], 128  }
  0x79   :  { %715 = vsyncadd [#allocation3], 4294967168 }
  0x7a   :  { %716 = dma.done.wait [#allocation6], 144  }
  0x7b   :  { %717 = vsyncadd [#allocation6], 4294967152 }
  0x7c   :  { %718 = dma.done.wait [#allocation9], 1040  }
  0x7d   :  { %719 = vsyncadd [#allocation9], 4294966256 }
  0x7e   :  { %720 = dma.done.wait [#allocation12], 1040  }
  0x7f   :  { %721 = vsyncadd [#allocation12], 4294966256  ;;  %v733_v0 = vmov 0.0   ;;  %vm734_vm0 = vmmov 0   ;;  %v521_v1 = vld [vmem:[#allocation5] sm:$0xff]   ;;  %v115_v2 = vld [vmem:[#allocation2] sm:$0xff] }
  0x80   :  { %463 = vmatprep.subr.bf16.mxu0 %v733_v0  ;;  %465 = vmatprep.mubr.msk.bf16.mxu0 %vm734_vm0, %v733_v0  ;;  %v116_v3 = vpack.c.bf16 %v115_v2, %v115_v2  ;;  %vm132_vm1 = vcmask 130048   ;;  %v522_v4 = vld [vmem:[#allocation8] sm:$0xff]   ;;  %v523_v5 = vld [vmem:[#allocation8 + $0x8] sm:$0xff]   ;;  %v524_v6 = vld [vmem:[#allocation8 + $0x10] sm:$0xff]   ;;  %s735_s6 = smov [#allocation14]   ;;  %vm402_vm2 = vcmask 31744  }
  0x81   :  { %469 = vmatprep.subr.bf16.mxu1 %v733_v0  ;;  %485 = vmatprep.mubr.msk.bf16.mxu1 %vm734_vm0, %v733_v0  ;;  %v525_v7 = vld [vmem:[#allocation8 + $0x18] sm:$0xff]   ;;  %v526_v8 = vld [vmem:[#allocation8 + $0x20] sm:$0xff]   ;;  %v527_v9 = vld [vmem:[#allocation8 + $0x28] sm:$0xff]   ;;  %s410_s13 = sshll.u32 %s735_s6, 4  ;;  %s411_s13 = int_to_ptr.vmem [resolvable:$true] %s410_s13 }
  0x82   :  { %464 = vmatpush3.bf16.msra.mxu0 %v521_v1  ;;  %470 = vmatpush3.bf16.msra.mxu1 %v522_v4  ;;  %v528_v10 = vld [vmem:[#allocation8 + $0x30] sm:$0xff]   ;;  %v529_v11 = vld [vmem:[#allocation8 + $0x38] sm:$0xff]   ;;  %v530_v12 = vld [vmem:[#allocation11] sm:$0xff]   ;;  %s692_s0 = scalar_lea.vmem %s411_s13, 128  ;;  %p697_p1 = scmp.lt.s32.totalorder %s411_s13, %s411_s13 }
  0x83   :  { %489 = vmatprep.subr.bf16.mxu0 %v733_v0  ;;  %471 = vmatprep.subr.bf16.mxu1 %v733_v0  ;;  %v531_v13 = vld [vmem:[#allocation11 + $0x8] sm:$0xff]   ;;  %v532_v14 = vld [vmem:[#allocation11 + $0x10] sm:$0xff]   ;;  %v533_v15 = vld [vmem:[#allocation11 + $0x18] sm:$0xff]   ;;  %p693_p0 = scmp.ne.s32.totalorder %s411_s13, %s692_s0  ;;  %p698_p2 = scmp.lt.s32.totalorder %s692_s0, %s692_s0 }
  0x84   :  { %v534_v16 = vld [vmem:[#allocation11 + $0x20] sm:$0xff]   ;;  %v535_v17 = vld [vmem:[#allocation11 + $0x28] sm:$0xff]   ;;  %v422_v18 = vld [vmem:[#allocation7] ss:$0 sm:$0xff] }
  0x85   :  { %466 = vmatmul.mubr.msk.bf16.vlgmr.msra.gmra.mrb[0].mxu0 %vm132_vm1, %v116_v3  ;;  %v536_v26 = vld [vmem:[#allocation11 + $0x30] sm:$0xff]   ;;  %v537_v27 = vld [vmem:[#allocation11 + $0x38] sm:$0xff]   ;;  %v434_v36 = vld [vmem:[#allocation13] ss:$0 sm:$0xff]  ;;  %p699_p3 = por %p698_p2, %p697_p1 }
  0x86   :  { %505 = vmatprep.mubr.msk.bf16.mxu0 %vm734_vm0, %v733_v0  ;;  %472 = vmatpush3.bf16.msra.mxu1 %v523_v5  ;;  %v425_v28 = vld [vmem:[#allocation10] ss:$0 sm:$0xff] }
  0x87   :  { %473 = vmatprep.subr.bf16.mxu1 %v733_v0  ;;  %490 = vmatpush3.bf16.msra.mxu0 %v530_v12  ;;  %p700_p4 = pnand %p699_p3, %p693_p0 }
  0x88   :  { %491 = vmatprep.subr.bf16.mxu0 %v733_v0 }
  0x8a   :  { %474 = vmatpush3.bf16.msra.mxu1 %v524_v6 }
  0x8b   :  { %475 = vmatprep.subr.bf16.mxu1 %v733_v0  ;;  %492 = vmatpush3.bf16.msra.mxu0 %v531_v13 }
  0x8c   :  { %493 = vmatprep.subr.bf16.mxu0 %v733_v0 }
  0x8e   :  { %476 = vmatpush3.bf16.msra.mxu1 %v525_v7 }
  0x8f   :  { %477 = vmatprep.subr.bf16.mxu1 %v733_v0  ;;  %494 = vmatpush3.bf16.msra.mxu0 %v532_v14 }
  0x90   :  { %495 = vmatprep.subr.bf16.mxu0 %v733_v0 }
  0x92   :  { %478 = vmatpush3.bf16.msra.mxu1 %v526_v8 }
  0x93   :  { %479 = vmatprep.subr.bf16.mxu1 %v733_v0  ;;  %496 = vmatpush3.bf16.msra.mxu0 %v533_v15 }
  0x94   :  { %497 = vmatprep.subr.bf16.mxu0 %v733_v0 }
  0x96   :  { %480 = vmatpush3.bf16.msra.mxu1 %v527_v9 }
  0x97   :  { %481 = vmatprep.subr.bf16.mxu1 %v733_v0  ;;  %498 = vmatpush3.bf16.msra.mxu0 %v534_v16 }
  0x98   :  { %499 = vmatprep.subr.bf16.mxu0 %v733_v0 }
  0x9a   :  { %482 = vmatpush3.bf16.msra.mxu1 %v528_v10 }
  0x9b   :  { %483 = vmatprep.subr.bf16.mxu1 %v733_v0  ;;  %500 = vmatpush3.bf16.msra.mxu0 %v535_v17 }
  0x9c   :  { %501 = vmatprep.subr.bf16.mxu0 %v733_v0 }
  0x9e   :  { %484 = vmatpush3.bf16.msra.mxu1 %v529_v11 }
  0x9f   :  { %502 = vmatpush3.bf16.msra.mxu0 %v536_v26 }
  0xa0   :  { %503 = vmatprep.subr.bf16.mxu0 %v733_v0 }
  0xa3   :  { %504 = vmatpush3.bf16.msra.mxu0 %v537_v27 }
 0x158   :  { %v170_v19 = vpop.f32.mrb[0].mxu0 }
 0x159   :  { %v171_v20 = vadd.f32 %v422_v18, %v170_v19  ;;  %v467_v21 = vpop.f32.mrb[1].mxu0 }
 0x15a   :  { %v173_v22 = vpop.f32.mrb[2].mxu0 }
 0x15b   :  { %v176_v23 = vmax.f32 %v171_v20, 0.0  ;;  %v468_v24 = vpop.f32.mrb[3].mxu0 }
 0x15d   :  { %v177_v25 = vpack.c.bf16 %v176_v23, %v176_v23 }
 0x15f   :  { %486 = vmatmul.mubr.bf16.vlgmr.msra.gmra.mrb[0].mxu1 %v177_v25 }
 0x232   :  { %v283_v29 = vpop.f32.mrb[0].mxu1 }
 0x233   :  { %v284_v30 = vadd.f32 %v425_v28, %v283_v29  ;;  %v487_v31 = vpop.f32.mrb[1].mxu1 }
 0x234   :  { %v286_v32 = vpop.f32.mrb[2].mxu1 }
 0x235   :  { %v289_v33 = vmax.f32 %v284_v30, 0.0  ;;  %v488_v34 = vpop.f32.mrb[3].mxu1 }
 0x237   :  { %v290_v35 = vpack.c.bf16 %v289_v33, %v289_v33 }
 0x239   :  { %506 = vmatmul.mubr.bf16.vlgmr.msra.gmra.mrb[4].mxu0 %v290_v35 }
 0x30c   :  { %v396_v37 = vpop.f32.mrb[4].mxu0 }
 0x30d   :  { %v397_v38 = vadd.f32 %v434_v36, %v396_v37  ;;  %v507_v39 = vpop.f32.mrb[5].mxu0 }
 0x30e   :  { %v399_v40 = vpop.f32.mrb[6].mxu0 }
 0x30f   :  { %v508_v41 = vpop.f32.mrb[7].mxu0  ;;  %403 = vst.msk [vmem:[#allocation14] sm:$0xff] %vm402_vm2, %v397_v38 }
 0x310   :  { %703 = shalt.err (!%p700_p4)
}
 0x311   :  { %s704_s15 = scalar_lea.hbm %s908_s7, 128 }
 0x312   :  { %p705_p5 = scmp.ne.s32.totalorder %s908_s7, %s704_s15  ;;  %p708_p6 = scmp.lt.u32.totalorder %s704_s15, %s908_s7 }
 0x314   :  { %p710_p7 = pnand %p708_p6, %p705_p5 }
 0x316   :  { %713 = shalt.err (!%p710_p7)
}
 0x317   :  { %413 = dma.vmem_to_hbm [thread:$0]  %s411_s13, 128, %s908_s7, [#allocation4]  }
 0x318   :  { %722 = dma.done.wait [#allocation4], 128  }
 0x319   :  { %723 = vsyncadd [#allocation4], 4294967168 }
 0x31a   :  { %417 = vsyncpa [#allocation3], 1 }
 0x31b   :  { %418 = vsyncpa [#allocation6], 1 }
 0x31c   :  { %419 = vsyncpa [#allocation9], 1 }
 0x31d   :  { %420 = vsyncpa [#allocation12], 1 }
 0x31e   :  { %421 = vsyncpa [#allocation4], 1 }

// kernel: tpu_custom_call.1
= control target key start
LH: loop header
LB: loop body
LE: loop exit
PB: predicated region body
PF: predicated region fallthrough
CT: control target
= control target key end

     0   :  { %12 = vsyncpa [#allocation3], 0  ;;  %s901_s0 = inlined_call_operand.hbm [shape: f32[8,16], index: 0, kind: input, shape index: {}]   ;;  %s902_s1 = inlined_call_operand.hbm [shape: bf16[16,128], index: 1, kind: input, shape index: {}]   ;;  %s903_s2 = inlined_call_operand.hbm [shape: f32[1,128], index: 2, kind: input, shape index: {}]   ;;  %s904_s3 = inlined_call_operand.hbm [shape: bf16[128,128], index: 3, kind: input, shape index: {}]   ;;  %s905_s4 = inlined_call_operand.hbm [shape: f32[1,128], index: 4, kind: input, shape index: {}]   ;;  %s906_s5 = inlined_call_operand.hbm [shape: bf16[128,4], index: 5, kind: input, shape index: {}]   ;;  %s907_s6 = inlined_call_operand.hbm [shape: f32[1,4], index: 6, kind: input, shape index: {}]   ;;  %s908_s7 = inlined_call_operand.hbm [shape: f32[8,4], index: 7, kind: output, shape index: {}]  }
   0x1   :  { %13 = vsyncpa [#allocation6], 0 }
   0x2   :  { %14 = vsyncpa [#allocation9], 0 }
   0x3   :  { %15 = vsyncpa [#allocation12], 0 }
   0x4   :  { %16 = vsyncpa [#allocation4], 0  ;;  %s724_s24 = smov [#allocation5]   ;;  %s538_s28 = scalar_lea.hbm %s902_s1, 128 }
   0x5   :  { %s32_s25 = sshll.u32 %s724_s24, 4  ;;  %p539_p0 = scmp.ne.s32.totalorder %s902_s1, %s538_s28  ;;  %s33_s25 = int_to_ptr.vmem [resolvable:$true] %s32_s25 }
   0x6   :  { %p542_p1 = scmp.lt.u32.totalorder %s538_s28, %s902_s1 }
   0x8   :  { %p544_p2 = pnand %p542_p1, %p539_p0 }
   0xa   :  { %547 = shalt.err (!%p544_p2)
}
   0xb   :  { %s548_s10 = scalar_lea.vmem %s33_s25, 128  ;;  %p553_p4 = scmp.lt.s32.totalorder %s33_s25, %s33_s25 }
   0xc   :  { %p549_p3 = scmp.ne.s32.totalorder %s33_s25, %s548_s10  ;;  %p554_p5 = scmp.lt.s32.totalorder %s548_s10, %s548_s10 }
   0xe   :  { %p555_p6 = por %p554_p5, %p553_p4 }
  0x10   :  { %p556_p7 = pnand %p555_p6, %p549_p3 }
  0x12   :  { %559 = shalt.err (!%p556_p7)
}
  0x13   :  { %s725_s11 = smov 64   ;;  %s726_s12 = smov 4  }
  0x14   :  { %38 = dma.hbm_to_vmem [thread:$0]  %s902_s1, 128, %s33_s25, [#allocation6], %s725_s11, %s725_s11, %s726_s12  }
  0x15   :  { %s727_s15 = smov [#allocation8]   ;;  %s728_s17 = smov [#allocation11]  }
  0x16   :  { %s54_s16 = sshll.u32 %s727_s15, 4  ;;  %s76_s18 = sshll.u32 %s728_s17, 4  ;;  %s55_s16 = int_to_ptr.vmem [resolvable:$true] %s54_s16  ;;  %s77_s18 = int_to_ptr.vmem [resolvable:$true] %s76_s18 }
  0x17   :  { %s560_s21 = scalar_lea.hbm %s904_s3, 1024 }
  0x18   :  { %p561_p8 = scmp.ne.s32.totalorder %s904_s3, %s560_s21  ;;  %p564_p9 = scmp.lt.u32.totalorder %s560_s21, %s904_s3 }
  0x1a   :  { %p566_p10 = pnand %p564_p9, %p561_p8 }
  0x1c   :  { %569 = shalt.err (!%p566_p10)
}
  0x1d   :  { %s570_s1 = scalar_lea.vmem %s55_s16, 1024  ;;  %p575_p12 = scmp.lt.s32.totalorder %s55_s16, %s55_s16 }
  0x1e   :  { %p571_p11 = scmp.ne.s32.totalorder %s55_s16, %s570_s1  ;;  %p576_p13 = scmp.lt.s32.totalorder %s570_s1, %s570_s1 }
  0x20   :  { %p577_p0 = por %p576_p13, %p575_p12 }
  0x22   :  { %p578_p1 = pnand %p577_p0, %p571_p11 }
  0x24   :  { %581 = shalt.err (!%p578_p1)
}
  0x25   :  { %60 = dma.hbm_to_vmem [thread:$0]  %s904_s3, 1024, %s55_s16, [#allocation9], %s725_s11, %s725_s11, %s726_s12  }
  0x26   :  { %s582_s30 = scalar_lea.hbm %s906_s5, 1024 }
  0x27   :  { %p583_p2 = scmp.ne.s32.totalorder %s906_s5, %s582_s30  ;;  %p586_p3 = scmp.lt.u32.totalorder %s582_s30, %s906_s5 }
  0x29   :  { %p588_p4 = pnand %p586_p3, %p583_p2 }
  0x2b   :  { %591 = shalt.err (!%p588_p4)
}
  0x2c   :  { %s592_s14 = scalar_lea.vmem %s77_s18, 1024  ;;  %p597_p6 = scmp.lt.s32.totalorder %s77_s18, %s77_s18 }
  0x2d   :  { %p593_p5 = scmp.ne.s32.totalorder %s77_s18, %s592_s14  ;;  %p598_p7 = scmp.lt.s32.totalorder %s592_s14, %s592_s14 }
  0x2f   :  { %p599_p8 = por %p598_p7, %p597_p6 }
  0x31   :  { %p600_p9 = pnand %p599_p8, %p593_p5 }
  0x33   :  { %603 = shalt.err (!%p600_p9)
}
  0x34   :  { %82 = dma.hbm_to_vmem [thread:$0]  %s906_s5, 1024, %s77_s18, [#allocation12], %s725_s11, %s725_s11, %s726_s12  }
  0x35   :  { %s729_s16 = smov [#allocation2]   ;;  %s730_s19 = smov [#allocation7]  }
  0x36   :  { %s23_s17 = sshll.u32 %s729_s16, 4  ;;  %s45_s20 = sshll.u32 %s730_s19, 4  ;;  %s24_s17 = int_to_ptr.vmem [resolvable:$true] %s23_s17  ;;  %s46_s20 = int_to_ptr.vmem [resolvable:$true] %s45_s20 }
  0x37   :  { %s604_s23 = scalar_lea.hbm %s901_s0, 128 }
  0x38   :  { %p605_p10 = scmp.ne.s32.totalorder %s901_s0, %s604_s23  ;;  %p608_p11 = scmp.lt.u32.totalorder %s604_s23, %s901_s0 }
  0x3a   :  { %p610_p12 = pnand %p608_p11, %p605_p10 }
  0x3c   :  { %613 = shalt.err (!%p610_p12)
}
  0x3d   :  { %s614_s5 = scalar_lea.vmem %s24_s17, 128  ;;  %p619_p0 = scmp.lt.s32.totalorder %s24_s17, %s24_s17 }
  0x3e   :  { %p615_p13 = scmp.ne.s32.totalorder %s24_s17, %s614_s5  ;;  %p620_p1 = scmp.lt.s32.totalorder %s614_s5, %s614_s5 }
  0x40   :  { %p621_p2 = por %p620_p1, %p619_p0 }
  0x42   :  { %p622_p3 = pnand %p621_p2, %p615_p13 }
  0x44   :  { %625 = shalt.err (!%p622_p3)
}
  0x45   :  { %26 = dma.hbm_to_vmem [thread:$0]  %s901_s0, 128, %s24_s17, [#allocation3]  }
  0x46   :  { %s626_s28 = scalar_lea.hbm %s903_s2, 16 }
  0x47   :  { %p627_p4 = scmp.ne.s32.totalorder %s903_s2, %s626_s28  ;;  %p630_p5 = scmp.lt.u32.totalorder %s626_s28, %s903_s2 }
  0x49   :  { %p632_p6 = pnand %p630_p5, %p627_p4 }
  0x4b   :  { %635 = shalt.err (!%p632_p6)
}
  0x4c   :  { %s636_s10 = scalar_lea.vmem %s46_s20, 16  ;;  %s640_s13 = scalar_lea.vmem %s46_s20, 32 }
  0x4d   :  { %p637_p7 = scmp.ne.s32.totalorder %s46_s20, %s636_s10  ;;  %p641_p8 = scmp.lt.s32.totalorder %s46_s20, %s46_s20 }
  0x4e   :  { %p642_p9 = scmp.lt.s32.totalorder %s640_s13, %s636_s10 }
  0x50   :  { %p643_p10 = por %p642_p9, %p641_p8 }
  0x52   :  { %p644_p11 = pnand %p643_p10, %p637_p7 }
  0x54   :  { %647 = shalt.err (!%p644_p11)
}
  0x55   :  { %48 = dma.hbm_to_vmem [thread:$0]  %s903_s2, 16, %s46_s20, [#allocation6]  }
  0x56   :  { %s731_s3 = smov [#allocation10]   ;;  %s732_s16 = smov [#allocation13]  }
  0x57   :  { %s67_s15 = sshll.u32 %s731_s3, 4  ;;  %s89_s17 = sshll.u32 %s732_s16, 4  ;;  %s68_s15 = int_to_ptr.vmem [resolvable:$true] %s67_s15  ;;  %s90_s17 = int_to_ptr.vmem [resolvable:$true] %s89_s17 }
  0x58   :  { %s648_s22 = scalar_lea.hbm %s905_s4, 16 }
  0x59   :  { %p649_p12 = scmp.ne.s32.totalorder %s905_s4, %s648_s22  ;;  %p652_p13 = scmp.lt.u32.totalorder %s648_s22, %s905_s4 }
  0x5b   :  { %p654_p0 = pnand %p652_p13, %p649_p12 }
  0x5d   :  { %657 = shalt.err (!%p654_p0)
}
  0x5e   :  { %s658_s2 = scalar_lea.vmem %s68_s15, 16  ;;  %s662_s20 = scalar_lea.vmem %s68_s15, 32 }
  0x5f   :  { %p659_p1 = scmp.ne.s32.totalorder %s68_s15, %s658_s2  ;;  %p663_p2 = scmp.lt.s32.totalorder %s68_s15, %s68_s15 }
  0x60   :  { %p664_p3 = scmp.lt.s32.totalorder %s662_s20, %s658_s2 }
  0x62   :  { %p665_p4 = por %p664_p3, %p663_p2 }
  0x64   :  { %p666_p5 = pnand %p665_p4, %p659_p1 }
  0x66   :  { %669 = shalt.err (!%p666_p5)
}
  0x67   :  { %70 = dma.hbm_to_vmem [thread:$0]  %s905_s4, 16, %s68_s15, [#allocation9]  }
  0x68   :  { %s670_s18 = scalar_lea.hbm %s907_s6, 16 }
  0x69   :  { %p671_p6 = scmp.ne.s32.totalorder %s907_s6, %s670_s18  ;;  %p674_p7 = scmp.lt.u32.totalorder %s670_s18, %s907_s6 }
  0x6b   :  { %p676_p8 = pnand %p674_p7, %p671_p6 }
  0x6d   :  { %679 = shalt.err (!%p676_p8)
}
  0x6e   :  { %s680_s8 = scalar_lea.vmem %s90_s17, 16  ;;  %s684_s9 = scalar_lea.vmem %s90_s17, 32 }
  0x6f   :  { %p681_p9 = scmp.ne.s32.totalorder %s90_s17, %s680_s8  ;;  %p685_p10 = scmp.lt.s32.totalorder %s90_s17, %s90_s17 }
  0x70   :  { %p686_p11 = scmp.lt.s32.totalorder %s684_s9, %s680_s8 }
  0x72   :  { %p687_p12 = por %p686_p11, %p685_p10 }
  0x74   :  { %p688_p13 = pnand %p687_p12, %p681_p9 }
  0x76   :  { %691 = shalt.err (!%p688_p13)
}
  0x77   :  { %92 = dma.hbm_to_vmem [thread:$0]  %s907_s6, 16, %s90_s17, [#allocation12]  }
  0x78   :  { %714 = dma.done.wait [#allocation3], 128  }
  0x79   :  { %715 = vsyncadd [#allocation3], 4294967168 }
  0x7a   :  { %716 = dma.done.wait [#allocation6], 144  }
  0x7b   :  { %717 = vsyncadd [#allocation6], 4294967152 }
  0x7c   :  { %718 = dma.done.wait [#allocation9], 1040  }
  0x7d   :  { %719 = vsyncadd [#allocation9], 4294966256 }
  0x7e   :  { %720 = dma.done.wait [#allocation12], 1040  }
  0x7f   :  { %721 = vsyncadd [#allocation12], 4294966256  ;;  %v733_v0 = vmov 0.0   ;;  %vm734_vm0 = vmmov 0   ;;  %v521_v1 = vld [vmem:[#allocation5] sm:$0xff]   ;;  %v115_v2 = vld [vmem:[#allocation2] sm:$0xff] }
  0x80   :  { %463 = vmatprep.subr.bf16.mxu0 %v733_v0  ;;  %465 = vmatprep.mubr.msk.bf16.mxu0 %vm734_vm0, %v733_v0  ;;  %v116_v3 = vpack.c.bf16 %v115_v2, %v115_v2  ;;  %vm132_vm1 = vcmask 130048   ;;  %v522_v4 = vld [vmem:[#allocation8] sm:$0xff]   ;;  %v523_v5 = vld [vmem:[#allocation8 + $0x8] sm:$0xff]   ;;  %v524_v6 = vld [vmem:[#allocation8 + $0x10] sm:$0xff]   ;;  %s735_s6 = smov [#allocation14]   ;;  %vm402_vm2 = vcmask 31744  }
  0x81   :  { %469 = vmatprep.subr.bf16.mxu1 %v733_v0  ;;  %485 = vmatprep.mubr.msk.bf16.mxu1 %vm734_vm0, %v733_v0  ;;  %v525_v7 = vld [vmem:[#allocation8 + $0x18] sm:$0xff]   ;;  %v526_v8 = vld [vmem:[#allocation8 + $0x20] sm:$0xff]   ;;  %v527_v9 = vld [vmem:[#allocation8 + $0x28] sm:$0xff]   ;;  %s410_s13 = sshll.u32 %s735_s6, 4  ;;  %s411_s13 = int_to_ptr.vmem [resolvable:$true] %s410_s13 }
  0x82   :  { %464 = vmatpush3.bf16.msra.mxu0 %v521_v1  ;;  %470 = vmatpush3.bf16.msra.mxu1 %v522_v4  ;;  %v528_v10 = vld [vmem:[#allocation8 + $0x30] sm:$0xff]   ;;  %v529_v11 = vld [vmem:[#allocation8 + $0x38] sm:$0xff]   ;;  %v530_v12 = vld [vmem:[#allocation11] sm:$0xff]   ;;  %s692_s0 = scalar_lea.vmem %s411_s13, 128  ;;  %p697_p1 = scmp.lt.s32.totalorder %s411_s13, %s411_s13 }
  0x83   :  { %489 = vmatprep.subr.bf16.mxu0 %v733_v0  ;;  %471 = vmatprep.subr.bf16.mxu1 %v733_v0  ;;  %v531_v13 = vld [vmem:[#allocation11 + $0x8] sm:$0xff]   ;;  %v532_v14 = vld [vmem:[#allocation11 + $0x10] sm:$0xff]   ;;  %v533_v15 = vld [vmem:[#allocation11 + $0x18] sm:$0xff]   ;;  %p693_p0 = scmp.ne.s32.totalorder %s411_s13, %s692_s0  ;;  %p698_p2 = scmp.lt.s32.totalorder %s692_s0, %s692_s0 }
  0x84   :  { %v534_v16 = vld [vmem:[#allocation11 + $0x20] sm:$0xff]   ;;  %v535_v17 = vld [vmem:[#allocation11 + $0x28] sm:$0xff]   ;;  %v422_v18 = vld [vmem:[#allocation7] ss:$0 sm:$0xff] }
  0x85   :  { %466 = vmatmul.mubr.msk.bf16.vlgmr.msra.gmra.mrb[0].mxu0 %vm132_vm1, %v116_v3  ;;  %v536_v26 = vld [vmem:[#allocation11 + $0x30] sm:$0xff]   ;;  %v537_v27 = vld [vmem:[#allocation11 + $0x38] sm:$0xff]   ;;  %v434_v36 = vld [vmem:[#allocation13] ss:$0 sm:$0xff]  ;;  %p699_p3 = por %p698_p2, %p697_p1 }
  0x86   :  { %505 = vmatprep.mubr.msk.bf16.mxu0 %vm734_vm0, %v733_v0  ;;  %472 = vmatpush3.bf16.msra.mxu1 %v523_v5  ;;  %v425_v28 = vld [vmem:[#allocation10] ss:$0 sm:$0xff] }
  0x87   :  { %473 = vmatprep.subr.bf16.mxu1 %v733_v0  ;;  %490 = vmatpush3.bf16.msra.mxu0 %v530_v12  ;;  %p700_p4 = pnand %p699_p3, %p693_p0 }
  0x88   :  { %491 = vmatprep.subr.bf16.mxu0 %v733_v0 }
  0x8a   :  { %474 = vmatpush3.bf16.msra.mxu1 %v524_v6 }
  0x8b   :  { %475 = vmatprep.subr.bf16.mxu1 %v733_v0  ;;  %492 = vmatpush3.bf16.msra.mxu0 %v531_v13 }
  0x8c   :  { %493 = vmatprep.subr.bf16.mxu0 %v733_v0 }
  0x8e   :  { %476 = vmatpush3.bf16.msra.mxu1 %v525_v7 }
  0x8f   :  { %477 = vmatprep.subr.bf16.mxu1 %v733_v0  ;;  %494 = vmatpush3.bf16.msra.mxu0 %v532_v14 }
  0x90   :  { %495 = vmatprep.subr.bf16.mxu0 %v733_v0 }
  0x92   :  { %478 = vmatpush3.bf16.msra.mxu1 %v526_v8 }
  0x93   :  { %479 = vmatprep.subr.bf16.mxu1 %v733_v0  ;;  %496 = vmatpush3.bf16.msra.mxu0 %v533_v15 }
  0x94   :  { %497 = vmatprep.subr.bf16.mxu0 %v733_v0 }
  0x96   :  { %480 = vmatpush3.bf16.msra.mxu1 %v527_v9 }
  0x97   :  { %481 = vmatprep.subr.bf16.mxu1 %v733_v0  ;;  %498 = vmatpush3.bf16.msra.mxu0 %v534_v16 }
  0x98   :  { %499 = vmatprep.subr.bf16.mxu0 %v733_v0 }
  0x9a   :  { %482 = vmatpush3.bf16.msra.mxu1 %v528_v10 }
  0x9b   :  { %483 = vmatprep.subr.bf16.mxu1 %v733_v0  ;;  %500 = vmatpush3.bf16.msra.mxu0 %v535_v17 }
  0x9c   :  { %501 = vmatprep.subr.bf16.mxu0 %v733_v0 }
  0x9e   :  { %484 = vmatpush3.bf16.msra.mxu1 %v529_v11 }
  0x9f   :  { %502 = vmatpush3.bf16.msra.mxu0 %v536_v26 }
  0xa0   :  { %503 = vmatprep.subr.bf16.mxu0 %v733_v0 }
  0xa3   :  { %504 = vmatpush3.bf16.msra.mxu0 %v537_v27 }
 0x158   :  { %v170_v19 = vpop.f32.mrb[0].mxu0 }
 0x159   :  { %v171_v20 = vadd.f32 %v422_v18, %v170_v19  ;;  %v467_v21 = vpop.f32.mrb[1].mxu0 }
 0x15a   :  { %v173_v22 = vpop.f32.mrb[2].mxu0 }
 0x15b   :  { %v176_v23 = vmax.f32 %v171_v20, 0.0  ;;  %v468_v24 = vpop.f32.mrb[3].mxu0 }
 0x15d   :  { %v177_v25 = vpack.c.bf16 %v176_v23, %v176_v23 }
 0x15f   :  { %486 = vmatmul.mubr.bf16.vlgmr.msra.gmra.mrb[0].mxu1 %v177_v25 }
 0x232   :  { %v283_v29 = vpop.f32.mrb[0].mxu1 }
 0x233   :  { %v284_v30 = vadd.f32 %v425_v28, %v283_v29  ;;  %v487_v31 = vpop.f32.mrb[1].mxu1 }
 0x234   :  { %v286_v32 = vpop.f32.mrb[2].mxu1 }
 0x235   :  { %v289_v33 = vmax.f32 %v284_v30, 0.0  ;;  %v488_v34 = vpop.f32.mrb[3].mxu1 }
 0x237   :  { %v290_v35 = vpack.c.bf16 %v289_v33, %v289_v33 }
 0x239   :  { %506 = vmatmul.mubr.bf16.vlgmr.msra.gmra.mrb[4].mxu0 %v290_v35 }
 0x30c   :  { %v396_v37 = vpop.f32.mrb[4].mxu0 }
 0x30d   :  { %v397_v38 = vadd.f32 %v434_v36, %v396_v37  ;;  %v507_v39 = vpop.f32.mrb[5].mxu0 }
 0x30e   :  { %v399_v40 = vpop.f32.mrb[6].mxu0 }
 0x30f   :  { %v508_v41 = vpop.f32.mrb[7].mxu0  ;;  %403 = vst.msk [vmem:[#allocation14] sm:$0xff] %vm402_vm2, %v397_v38 }
 0x310   :  { %703 = shalt.err (!%p700_p4)
}
 0x311   :  { %s704_s15 = scalar_lea.hbm %s908_s7, 128 }
 0x312   :  { %p705_p5 = scmp.ne.s32.totalorder %s908_s7, %s704_s15  ;;  %p708_p6 = scmp.lt.u32.totalorder %s704_s15, %s908_s7 }
 0x314   :  { %p710_p7 = pnand %p708_p6, %p705_p5 }
 0x316   :  { %713 = shalt.err (!%p710_p7)
}
 0x317   :  { %413 = dma.vmem_to_hbm [thread:$0]  %s411_s13, 128, %s908_s7, [#allocation4]  }
 0x318   :  { %722 = dma.done.wait [#allocation4], 128  }
 0x319   :  { %723 = vsyncadd [#allocation4], 4294967168 }
 0x31a   :  { %417 = vsyncpa [#allocation3], 1 }
 0x31b   :  { %418 = vsyncpa [#allocation6], 1 }
 0x31c   :  { %419 = vsyncpa [#allocation9], 1 }
 0x31d   :  { %420 = vsyncpa [#allocation12], 1 }
 0x31e   :  { %421 = vsyncpa [#allocation4], 1 }

</bundles_post_ra>
